<compile_context>
chip_gen: v5e
topology: v5e:2x2
jax: 0.10.0
libtpu: 0.0.40
codegen_flags: <defaults>
</compile_context>

<pallas_src>
import numpy as np

import jax
import jax.numpy as jnp
from jax.experimental import pallas as pl
from jax.experimental.pallas import tpu as pltpu


def _nearest_src_indices(out_size: int, in_size: int) -> np.ndarray:
    # PyTorch mode='nearest' (legacy, NOT 'nearest-exact'), replicated in float32:
    #   scale = float(in) / out;  src = min(int(dst * scale), in - 1)
    scale = np.float32(in_size) / np.float32(out_size)
    idx = (np.arange(out_size, dtype=np.float32) * scale).astype(np.int64)
    return np.minimum(idx, in_size - 1).astype(np.int32)


def _separable_nearest_kernel(sh_ref, sw_ref, x_ref, o_ref):
    # sh_ref: (bh, h_in)    f32 one-hot rows   (output row i selects input row h_idx[i])
    # sw_ref: (w_in, w_out) f32 one-hot cols   (output col j selects input col w_idx[j])
    # x_ref : (bm, h_in, w_in)  input channel-slices
    # o_ref : (bm, bh, w_out)   output tile (lane dim = full w_out)
    sh = sh_ref[...]
    sw = sw_ref[...]
    bm = x_ref.shape[0]
    for m in range(bm):  # static unroll; bm is kept small by the wrapper (<= 32)
        xm = x_ref[m].astype(jnp.float32)                                  # (h_in, w_in)
        xh = jnp.dot(sh, xm, preferred_element_type=jnp.float32)           # (bh, w_in)  H-select
        om = jnp.dot(xh, sw, preferred_element_type=jnp.float32)           # (bh, w_out) W-expand
        o_ref[m] = om.astype(o_ref.dtype)


def _choose_blocks(m_total, h_in, w_in, h_out, w_out, in_isz, out_isz,
                   budget_bytes=12 * 1024 * 1024, max_bm=32):
    """Pick (bm, bh): bm divides M exactly (no row padding), bh = h_out or a
    multiple-of-8 divisor of h_out.  Fits a conservative double-buffered VMEM
    budget that is valid on v5e (16 MiB scoped), v6e and v7x (64 MiB physical)."""

    def vmem_est(bm, bh):
        x_blk = bm * h_in * w_in * in_isz
        sh_b = bh * h_in * 4
        sw_b = w_in * w_out * 4
        o_blk = bm * bh * w_out * out_isz
        # in-kernel f32 temporaries: cast input, H-selected rows, f32 accumulators
        tmp = bm * h_in * w_in * 4 + bm * bh * w_in * 4 + bm * bh * w_out * 4
        return 2 * (x_blk + sh_b + sw_b + o_blk) + tmp

    m_divisors = [d for d in range(1, min(m_total, max_bm) + 1) if m_total % d == 0]

    def h_block_candidates():
        yield h_out                                   # no h tiling (always legal)
        if h_out % 8 == 0:                            # multiple-of-8 divisors, descending
            for bh in range(h_out - 8, 0, -8):
                if h_out % bh == 0:
                    yield bh

    total_out = m_total * h_out * w_out * out_isz
    for bh in h_block_candidates():
        fits = [bm for bm in m_divisors if vmem_est(bm, bh) <= budget_bytes]
        if not fits:
            continue
        bm = max(fits)
        # Prefer >= 2 grid steps for non-trivial outputs: lets the DMA pipeline
        # overlap and lets v7x shard the "parallel" axes across both TensorCores.
        if (m_total // bm) * (h_out // bh) < 2 and total_out > (256 << 10):
            smaller = [b for b in fits if b < bm]
            if smaller:
                bm = max(smaller)
        return bm, bh

    raise ValueError(
        "nearest_interpolate_nchw: even a single (1, h_in, w_in) input slice plus "
        "one output row-block exceeds the VMEM budget. "
        "TODO(synk): add W tiling for very large spatial shapes.")


def nearest_interpolate_nchw(x: jnp.ndarray, size) -> jnp.ndarray:
    """torch.nn.functional.interpolate(x, size, mode='nearest') for NCHW input."""
    if isinstance(size, int):
        size = (int(size), int(size))
    h_out, w_out = int(size[0]), int(size[1])

    assert x.ndim == 4, "expected NCHW input"
    n, c, h_in, w_in = x.shape
    out_dtype = x.dtype
    # TODO(synk): integer inputs are routed through f32 (exact only for |x| < 2**24).

    m_total = n * c
    in_isz = np.dtype(x.dtype).itemsize
    out_isz = np.dtype(out_dtype).itemsize

    # Torch-exact nearest source indices (host-side, static).
    h_idx = _nearest_src_indices(h_out, h_in)                       # (h_out,)
    w_idx = _nearest_src_indices(w_out, w_in)                       # (w_out,)

    # Tiny separable one-hot selection matrices (h_out*h_in + w_in*w_out elements,
    # ~400x smaller than the full kron); read once by the kernel.
    sh = jnp.asarray((h_idx[:, None] == np.arange(h_in, dtype=np.int32)[None, :])
                     .astype(np.float32))                           # (h_out, h_in)
    sw = jnp.asarray((np.arange(w_in, dtype=np.int32)[:, None] == w_idx[None, :])
                     .astype(np.float32))                           # (w_in, w_out)

    bm, bh = _choose_blocks(m_total, h_in, w_in, h_out, w_out, in_isz, out_isz)
    grid = (m_total // bm, h_out // bh)

    x3 = x.reshape(m_total, h_in, w_in)                             # free reshape

    cost = pl.CostEstimate(
        flops=2 * m_total * h_out * w_in * (h_in + w_out),
        transcendentals=0,
        bytes_accessed=(x3.size * in_isz + sh.size * 4 + sw.size * 4
                        + m_total * h_out * w_out * out_isz),
    )

    out3 = pl.pallas_call(
        _separable_nearest_kernel,
        out_shape=jax.ShapeDtypeStruct((m_total, h_out, w_out), out_dtype),
        grid=grid,
        in_specs=[
            pl.BlockSpec((bh, h_in), lambda i, hb: (hb, 0)),          # Rh: tiled over h
            pl.BlockSpec((w_in, w_out), lambda i, hb: (0, 0)),        # Rw: resident
            pl.BlockSpec((bm, h_in, w_in), lambda i, hb: (i, 0, 0)),  # x: resident across hb
        ],
        out_specs=pl.BlockSpec((bm, bh, w_out), lambda i, hb: (i, hb, 0)),
        compiler_params=pltpu.CompilerParams(
            dimension_semantics=("parallel", "parallel")),
        cost_estimate=cost,
    )(sh, sw, x3)

    # Metadata-only reshape (no copy): (N*C, Hout, Wout) -> (N, C, Hout, Wout).
    return out3.reshape(n, c, h_out, w_out)


class MetadataEncoder:
    """JAX/Pallas port of the PyTorch MetadataEncoder (forward = nearest interpolate)."""

    def __init__(self, metadata_size: int = 6, metadata_features: int = 64,
                 size: int = 132, num_of_blocks: int = 2) -> None:
        # The PyTorch module declares these hyper-params but its forward only
        # depends on `size`; there are no learnable parameters.
        self.size = size

    def __call__(self, x: jnp.ndarray, size=None) -> jnp.ndarray:
        if size is None:
            size = self.size
        return nearest_interpolate_nchw(x, size)


def _reference_nearest(x, h_out, w_out):
    # Pure-JAX reference matching torch.nn.functional.interpolate(x, size, mode='nearest')
    h_idx = _nearest_src_indices(h_out, x.shape[2])
    w_idx = _nearest_src_indices(w_out, x.shape[3])
    return x[:, :, h_idx, :][:, :, :, w_idx]


if __name__ == "__main__":
    key = jax.random.PRNGKey(0)
    enc = MetadataEncoder()                                        # default size=132

    # (1) Small NCHW input, module-default target size 132x132.
    x = jax.random.normal(key, (2, 4, 16, 16), dtype=jnp.float32)
    y = jax.block_until_ready(enc(x))
    assert y.shape == (2, 4, 132, 132), y.shape
    assert jnp.array_equal(y, _reference_nearest(x, 132, 132)), "mismatch (16x16 -> 132x132)"

    # (2) Module-default metadata map (6 channels, 6x6), non-square target.
    x2 = jax.random.normal(jax.random.PRNGKey(1), (1, 6, 6, 6), dtype=jnp.float32)
    y2 = jax.block_until_ready(enc(x2, size=(132, 96)))
    assert y2.shape == (1, 6, 132, 96), y2.shape
    assert jnp.array_equal(y2, _reference_nearest(x2, 132, 96)), "mismatch (6x6 -> 132x96)"

    # (3) Non-integer ratios exercise the torch-exact nearest index formula.
    x3 = jax.random.normal(jax.random.PRNGKey(2), (1, 3, 5, 7), dtype=jnp.float32)
    y3 = jax.block_until_ready(enc(x3, size=(11, 13)))
    assert y3.shape == (1, 3, 11, 13), y3.shape
    assert jnp.array_equal(y3, _reference_nearest(x3, 11, 13)), "mismatch (5x7 -> 11x13)"

    print("KERNEL_OK")
</pallas_src>

<mosaic_0001>
module attributes {stable_mosaic.version = 11 : i64} {
  func.func @_separable_nearest_kernel(%arg0: i32, %arg1: i32, %arg2: memref<132x16xf32, #tpu.memory_space<vmem>>, %arg3: memref<16x132xf32, #tpu.memory_space<vmem>>, %arg4: memref<4x16x16xf32, #tpu.memory_space<vmem>>, %arg5: memref<4x132x132xf32, #tpu.memory_space<vmem>>) attributes {dimension_semantics = [#tpu.dimension_semantics<parallel>, #tpu.dimension_semantics<parallel>], iteration_bounds = array<i64: 2, 1>, scalar_prefetch = 0 : i64, scratch_operands = 0 : i64, tpu.core_type = #tpu.core_type<tc>, window_params = [{transform_indices = @transform_0, window_bounds = array<i64: 132, 16>}, {pipeline_mode = #tpu.pipeline_mode<synchronous>, transform_indices = @transform_1, window_bounds = array<i64: 16, 132>}, {transform_indices = @transform_2, window_bounds = array<i64: 4, 16, 16>}, {transform_indices = @transform_3, window_bounds = array<i64: 4, 132, 132>}]} {
    %c0 = arith.constant 0 : index
    %c0_0 = arith.constant 0 : index
    %0 = vector.load %arg2[%c0, %c0_0] : memref<132x16xf32, #tpu.memory_space<vmem>>, vector<132x16xf32>
    %c0_1 = arith.constant 0 : index
    %c0_2 = arith.constant 0 : index
    %1 = vector.load %arg3[%c0_1, %c0_2] : memref<16x132xf32, #tpu.memory_space<vmem>>, vector<16x132xf32>
    %c0_3 = arith.constant 0 : index
    %c0_4 = arith.constant 0 : index
    %c0_5 = arith.constant 0 : index
    %2 = vector.load %arg4[%c0_3, %c0_4, %c0_5] : memref<4x16x16xf32, #tpu.memory_space<vmem>>, vector<1x16x16xf32>
    %3 = vector.shape_cast %2 : vector<1x16x16xf32> to vector<16x16xf32>
    %cst = arith.constant dense<0.000000e+00> : vector<132x16xf32>
    %4 = tpu.matmul %0, %3, %cst {dimension_numbers = #tpu.dot_dimension_numbers<[1], [0], [0], [1], [0, 0, 1, 1], [], []>} : vector<132x16xf32>, vector<16x16xf32>, vector<132x16xf32> -> vector<132x16xf32>
    %cst_6 = arith.constant dense<0.000000e+00> : vector<132x132xf32>
    %5 = tpu.matmul %4, %1, %cst_6 {dimension_numbers = #tpu.dot_dimension_numbers<[1], [0], [0], [1], [0, 0, 1, 1], [], []>} : vector<132x16xf32>, vector<16x132xf32>, vector<132x132xf32> -> vector<132x132xf32>
    %c0_7 = arith.constant 0 : index
    %c0_8 = arith.constant 0 : index
    %c0_9 = arith.constant 0 : index
    %6 = vector.load %arg5[%c0_7, %c0_8, %c0_9] : memref<4x132x132xf32, #tpu.memory_space<vmem>>, vector<1x132x132xf32>
    %7 = vector.shape_cast %6 : vector<1x132x132xf32> to vector<132x132xf32>
    %8 = vector.shape_cast %5 : vector<132x132xf32> to vector<1x132x132xf32>
    tpu.vector_store %arg5[%c0_7, %c0_8, %c0_9], %8 {strides = array<i32>} : memref<4x132x132xf32, #tpu.memory_space<vmem>>, vector<1x132x132xf32>,
    %c1 = arith.constant 1 : index
    %c0_10 = arith.constant 0 : index
    %c0_11 = arith.constant 0 : index
    %9 = vector.load %arg4[%c1, %c0_10, %c0_11] : memref<4x16x16xf32, #tpu.memory_space<vmem>>, vector<1x16x16xf32>
    %10 = vector.shape_cast %9 : vector<1x16x16xf32> to vector<16x16xf32>
    %cst_12 = arith.constant dense<0.000000e+00> : vector<132x16xf32>
    %11 = tpu.matmul %0, %10, %cst_12 {dimension_numbers = #tpu.dot_dimension_numbers<[1], [0], [0], [1], [0, 0, 1, 1], [], []>} : vector<132x16xf32>, vector<16x16xf32>, vector<132x16xf32> -> vector<132x16xf32>
    %cst_13 = arith.constant dense<0.000000e+00> : vector<132x132xf32>
    %12 = tpu.matmul %11, %1, %cst_13 {dimension_numbers = #tpu.dot_dimension_numbers<[1], [0], [0], [1], [0, 0, 1, 1], [], []>} : vector<132x16xf32>, vector<16x132xf32>, vector<132x132xf32> -> vector<132x132xf32>
    %c1_14 = arith.constant 1 : index
    %c0_15 = arith.constant 0 : index
    %c0_16 = arith.constant 0 : index
    %13 = vector.load %arg5[%c1_14, %c0_15, %c0_16] : memref<4x132x132xf32, #tpu.memory_space<vmem>>, vector<1x132x132xf32>
    %14 = vector.shape_cast %13 : vector<1x132x132xf32> to vector<132x132xf32>
    %15 = vector.shape_cast %12 : vector<132x132xf32> to vector<1x132x132xf32>
    tpu.vector_store %arg5[%c1_14, %c0_15, %c0_16], %15 {strides = array<i32>} : memref<4x132x132xf32, #tpu.memory_space<vmem>>, vector<1x132x132xf32>,
    %c2 = arith.constant 2 : index
    %c0_17 = arith.constant 0 : index
    %c0_18 = arith.constant 0 : index
    %16 = vector.load %arg4[%c2, %c0_17, %c0_18] : memref<4x16x16xf32, #tpu.memory_space<vmem>>, vector<1x16x16xf32>
    %17 = vector.shape_cast %16 : vector<1x16x16xf32> to vector<16x16xf32>
    %cst_19 = arith.constant dense<0.000000e+00> : vector<132x16xf32>
    %18 = tpu.matmul %0, %17, %cst_19 {dimension_numbers = #tpu.dot_dimension_numbers<[1], [0], [0], [1], [0, 0, 1, 1], [], []>} : vector<132x16xf32>, vector<16x16xf32>, vector<132x16xf32> -> vector<132x16xf32>
    %cst_20 = arith.constant dense<0.000000e+00> : vector<132x132xf32>
    %19 = tpu.matmul %18, %1, %cst_20 {dimension_numbers = #tpu.dot_dimension_numbers<[1], [0], [0], [1], [0, 0, 1, 1], [], []>} : vector<132x16xf32>, vector<16x132xf32>, vector<132x132xf32> -> vector<132x132xf32>
    %c2_21 = arith.constant 2 : index
    %c0_22 = arith.constant 0 : index
    %c0_23 = arith.constant 0 : index
    %20 = vector.load %arg5[%c2_21, %c0_22, %c0_23] : memref<4x132x132xf32, #tpu.memory_space<vmem>>, vector<1x132x132xf32>
    %21 = vector.shape_cast %20 : vector<1x132x132xf32> to vector<132x132xf32>
    %22 = vector.shape_cast %19 : vector<132x132xf32> to vector<1x132x132xf32>
    tpu.vector_store %arg5[%c2_21, %c0_22, %c0_23], %22 {strides = array<i32>} : memref<4x132x132xf32, #tpu.memory_space<vmem>>, vector<1x132x132xf32>,
    %c3 = arith.constant 3 : index
    %c0_24 = arith.constant 0 : index
    %c0_25 = arith.constant 0 : index
    %23 = vector.load %arg4[%c3, %c0_24, %c0_25] : memref<4x16x16xf32, #tpu.memory_space<vmem>>, vector<1x16x16xf32>
    %24 = vector.shape_cast %23 : vector<1x16x16xf32> to vector<16x16xf32>
    %cst_26 = arith.constant dense<0.000000e+00> : vector<132x16xf32>
    %25 = tpu.matmul %0, %24, %cst_26 {dimension_numbers = #tpu.dot_dimension_numbers<[1], [0], [0], [1], [0, 0, 1, 1], [], []>} : vector<132x16xf32>, vector<16x16xf32>, vector<132x16xf32> -> vector<132x16xf32>
    %cst_27 = arith.constant dense<0.000000e+00> : vector<132x132xf32>
    %26 = tpu.matmul %25, %1, %cst_27 {dimension_numbers = #tpu.dot_dimension_numbers<[1], [0], [0], [1], [0, 0, 1, 1], [], []>} : vector<132x16xf32>, vector<16x132xf32>, vector<132x132xf32> -> vector<132x132xf32>
    %c3_28 = arith.constant 3 : index
    %c0_29 = arith.constant 0 : index
    %c0_30 = arith.constant 0 : index
    %27 = vector.load %arg5[%c3_28, %c0_29, %c0_30] : memref<4x132x132xf32, #tpu.memory_space<vmem>>, vector<1x132x132xf32>
    %28 = vector.shape_cast %27 : vector<1x132x132xf32> to vector<132x132xf32>
    %29 = vector.shape_cast %26 : vector<132x132xf32> to vector<1x132x132xf32>
    tpu.vector_store %arg5[%c3_28, %c0_29, %c0_30], %29 {strides = array<i32>} : memref<4x132x132xf32, #tpu.memory_space<vmem>>, vector<1x132x132xf32>,
    return
  }
  func.func @transform_0(%arg0: i32, %arg1: i32) -> (i32, i32) {
    %c0_i32 = arith.constant 0 : i32
    %c0_i32_0 = arith.constant 0 : i32
    return %arg1, %c0_i32 : i32, i32
  }
  func.func @transform_1(%arg0: i32, %arg1: i32) -> (i32, i32) {
    %c0_i32 = arith.constant 0 : i32
    %c0_i32_0 = arith.constant 0 : i32
    %c0_i32_1 = arith.constant 0 : i32
    return %c0_i32, %c0_i32_0 : i32, i32
  }
  func.func @transform_2(%arg0: i32, %arg1: i32) -> (i32, i32, i32) {
    %c0_i32 = arith.constant 0 : i32
    %c0_i32_0 = arith.constant 0 : i32
    %c0_i32_1 = arith.constant 0 : i32
    return %arg0, %c0_i32, %c0_i32_0 : i32, i32, i32
  }
  func.func @transform_3(%arg0: i32, %arg1: i32) -> (i32, i32, i32) {
    %c0_i32 = arith.constant 0 : i32
    %c0_i32_0 = arith.constant 0 : i32
    return %arg0, %arg1, %c0_i32 : i32, i32, i32
  }
}

</mosaic_0001>

<bundles_post_ra>
// kernel: tpu_custom_call.1
= control target key start
LH: loop header
LB: loop body
LE: loop exit
PB: predicated region body
PF: predicated region fallthrough
CT: control target
= control target key end

     0   :  { %8 = vsyncpa [#allocation3], 0  ;;  %s2863_s0 = inlined_call_operand.vmem [shape: f32[132,16], index: 0, kind: input, shape index: {}]   ;;  %s2864_s1 = inlined_call_operand.hbm [shape: f32[16,132], index: 1, kind: input, shape index: {}]   ;;  %s2865_s2 = inlined_call_operand.hbm [shape: f32[8,16,16], index: 2, kind: input, shape index: {}]   ;;  %s2866_s3 = inlined_call_operand.vmem [shape: f32[8,132,132], index: 3, kind: output, shape index: {}]  }
   0x1   :  { %9 = vsyncpa [#allocation5], 0 }
   0x2   :  { %11 = vsyncpa [#allocation5 + $0x1], 0  ;;  %s2178_s12 = smov 0   ;;  %s2180_s13 = smov 0  }
   0x3   :  { %s2182_s14 = smov 0   ;;  %s2184_s15 = smov 0  }
   0x4   :  { %s2186_s16 = smov 0   ;;  %s2188_s17 = smov 0  }
   0x5 LB: > { %s1635_s18 = sadd.s32 4294967295, %s2151_s17   ;;  %p96_p0 = scmp.ne.s32.totalorder %s2135_s13, %s2131_s12  ;;  %s2151_s17 = sphi %s2188_s17, %s17_s17   ;;  %s2147_s16 = sphi %s2186_s16, %s2875_s16   ;;  %s2143_s15 = sphi %s2184_s15, %s2874_s15   ;;  %s2139_s14 = sphi %s2182_s14, %s2873_s14   ;;  %s2135_s13 = sphi %s2180_s13, %s2872_s13   ;;  %s2131_s12 = sphi %s2178_s12, %s2871_s12  }
   0x6   : > { %p2208_p1 = scmp.eq.s32.totalorder %s1635_s18, 0  ;;  %p1637_p2 = scmp.ge.s32.totalorder %s2151_s17, 1 }
   0x7   : > { %p135_p3 = scmp.lt.s32.totalorder %s2151_s17, 3  ;;  %s155_s23 = sshll.u32 %s2864_s1, 4  ;;  %s156_s23 = int_to_ptr.hbm [resolvable:$true] %s155_s23 }
   0x8   : > { %p2216_p4 = por %p2208_p1, %p96_p0  ;;  %s2153_s25 = smov [#allocation2]  }
   0x9   : > { %p2223_p5 = pnand %p1637_p2, %p135_p3  ;;  %s157_s26 = sshll.u32 %s2153_s25, 4  ;;  %s158_s26 = int_to_ptr.vmem [resolvable:$true] %s157_s26 }
   0xa   : > { %s2154_s27 = smov 256   ;;  %s2155_s28 = smov 16  }
   0xb   : > { %p1973_p6 = pneg %p2223_p5  ;;  %s29_s29 = sadd.s32 1, %s2147_s16 }
   0xc   : > { %p31_p8 = scmp.ge.s32.totalorder %s29_s29, 2  ;;  %s83_s30 = sadd.s32 1, %s2139_s14 }
   0xd   : > { %p1974_p7 = pnand %p1973_p6, %p2208_p1  ;;  %p90_p9 = scmp.ne.s32.totalorder %s2139_s14, %s2135_s13 }
   0xe   : > { %p91_p10 = scmp.eq.s32.totalorder %s2151_s17, 0  ;;  %s2877_s29 = smov (%p31_p8, %s29_s29), 0 }
   0xf   : > { %1976 = dma.hbm_to_vmem [thread:$0]  (!%p1974_p7), %s156_s23, 512, %s158_s26, [#allocation3], %s2154_s27, %s2154_s27, %s2155_s28  }
  0x10   : > { %p2238_p11 = por %p91_p10, %p90_p9  ;;  %p1982_p12 = scmp.lt.s32.totalorder %s2151_s17, 2 }
  0x11   : > { %s80_s5 = ssub.s32 %s2147_s16, %s2877_s29  ;;  %s171_s6 = sand.u32 1, %s2139_s14  }
  0x12   : > { %p81_p13 = scmp.eq.s32.totalorder %s80_s5, 0  ;;  %s1641_s7 = sshll.u32 %s171_s6, 6 }
  0x13   : > { %s1965_s8 = sshll.u32 %s2147_s16, 6  ;;  %s175_s21 = scalar_lea.vmem [#allocation4], %s1641_s7 }
  0x14   : > { %s2248_s9 = scalar_select %p81_p13, %s2139_s14, %s83_s30  }
  0x15   : > { %s181_s12 = scalar_lea.hbm %s2865_s2, %s1965_s8  ;;  %s184_s22 = sshll.u32 %s175_s21, 4  ;;  %s185_s22 = int_to_ptr.vmem [resolvable:$true] %s184_s22 }
  0x16   : > { %s182_s18 = sshll.u32 %s181_s12, 4  ;;  %p1978_p0 = pnand %p1982_p12, %p2238_p11  ;;  %s183_s18 = int_to_ptr.hbm [resolvable:$true] %s182_s18 }
  0x17   : > { %s172_s23 = scalar_lea.sflag [#allocation5], %s171_s6  ;;  %s2156_s25 = smov 128  }
  0x18   : > { %s2157_s26 = smov 8   ;;  %196 = sbr.rel (%p2223_p5) target bundleno = 829 (0x33d), region = 32 }
  0x19   : > { %1980 = dma.hbm_to_vmem [thread:$0]  (!%p1978_p0), %s183_s18, 1024, %s185_s22, %s172_s23, %s2156_s25, %s2156_s25, %s2157_s26  }
  0x1d   : > { %2122 = dma.done.wait (%p2208_p1), [#allocation3], 512  }
  0x1e   : > { %2124 = vsyncadd (%p2208_p1), [#allocation3], 4294966784  ;;  %s203_s27 = sand.u32 1, %s2135_s13  }
  0x1f   : > { %s1647_s28 = sshll.u32 %s203_s27, 6  ;;  %s204_s30 = scalar_lea.sflag [#allocation5], %s203_s27 }
  0x20   : > { %s2264_s4 = scalar_lea.vmem [#allocation4], %s1647_s28 }
  0x21   : > { %2126 = dma.done.wait (%p2216_p4), %s204_s30, 1024  }
  0x22   : > { %2128 = vsyncadd (%p2216_p4), %s204_s30, 4294966272  ;;  %v284_v0 = vld [vmem:[%s2264_s4 + $0x8] sm:$0xff]  ;;  %v283_v1 = vld [vmem:[%s2264_s4] sm:$0xff]  ;;  %vm285_vm0 = vcmask 130048   ;;  %s1648_s26 = sshll.u32 %s2143_s15, 2  ;;  %vm593_vm1 = vcmask 31744  }
  0x23   : > { %351 = vmatpush.msra.mxu0 %v284_v0  ;;  %v2275_v2 = vld [vmem:[%s2863_s0] sm:$0xff]  ;;  %v2282_v3 = vld [vmem:[%s2863_s0 + $0x8] sm:$0xff]  ;;  %v2289_v4 = vld [vmem:[%s2863_s0 + $0x10] sm:$0xff]  ;;  %p251_p1 = scmp.lt.s32.totalorder %s1648_s26, 7  ;;  %vm626_vm2 = vcmask 27648  }
  0x24   : > { %v2296_v5 = vld [vmem:[%s2863_s0 + $0x18] sm:$0xff]  ;;  %v2303_v6 = vld [vmem:[%s2863_s0 + $0x20] sm:$0xff]  ;;  %v2310_v7 = vld [vmem:[%s2863_s0 + $0x28] sm:$0xff] }
  0x25   : > { %352 = vmatpush.msra.mxu0 %v283_v1  ;;  %v2317_v8 = vld [vmem:[%s2863_s0 + $0x30] sm:$0xff]  ;;  %v2324_v9 = vld [vmem:[%s2863_s0 + $0x38] sm:$0xff]  ;;  %v2331_v10 = vld [vmem:[%s2863_s0 + $0x40] sm:$0xff]  ;;  %s2879_s26 = smov (!%p251_p1, %s1648_s26), 7 }
  0x26   : > { %1650 = vmatmul.msk.f32.vlgmr.msra.gmra.mxu0 %vm285_vm0, %v2275_v2  ;;  %v2338_v11 = vld [vmem:[%s2863_s0 + $0x48] sm:$0xff]  ;;  %v2345_v12 = vld [vmem:[%s2863_s0 + $0x50] sm:$0xff]  ;;  %v2352_v13 = vld [vmem:[%s2863_s0 + $0x58] sm:$0xff]  ;;  %s1966_s27 = smul.u32 272, %s2879_s26 }
  0x27   : > { %v281_v14 = vld [vmem:[#allocation2 + $0x10] sm:$0xff]  ;;  %v282_v15 = vld [vmem:[#allocation2 + $0x18] sm:$0xff]  ;;  %v279_v17 = vld [vmem:[#allocation2] sm:$0xff] }
  0x28   : > { %v1702_v16 = vld [vmem:[%s2264_s4 + $0x18] sm:$0xff]  ;;  %470 = vmatpush.msra.mxu1 %v281_v14  ;;  %538 = vmatpush.msra.mxu2 %v282_v15  ;;  %v280_v18 = vld [vmem:[#allocation2 + $0x8] sm:$0xff]  ;;  %v1701_v19 = vld [vmem:[%s2264_s4 + $0x10] sm:$0xff]  ;;  %s2469_s30 = scalar_lea.vmem %s2866_s3, %s1966_s27 }
  0x29   : > { %645 = vmatpush.msra.mxu3 %v1702_v16  ;;  %764 = vmatpush.msrb.mxu0 %v281_v14  ;;  %v2361_v20 = vld [vmem:[%s2863_s0 + $0x60] sm:$0xff]  ;;  %v1789_v21 = vld [vmem:[%s2264_s4 + $0x28] sm:$0xff]  ;;  %v2380_v23 = vld [vmem:[%s2863_s0 + $0x70] sm:$0xff] }
  0x2a   : > { %471 = vmatpush.msra.mxu1 %v279_v17  ;;  %539 = vmatpush.msra.mxu2 %v280_v18  ;;  %v2371_v22 = vld [vmem:[%s2863_s0 + $0x68] sm:$0xff]  ;;  %v2389_v24 = vld [vmem:[%s2863_s0 + $0x78] sm:$0xff]  ;;  %v2398_v26 = vld [vmem:[%s2863_s0 + $0x80] sm:$0xf] }
  0x2b   : > { %646 = vmatpush.msra.mxu3 %v1701_v19  ;;  %765 = vmatpush.msrb.mxu0 %v279_v17  ;;  %v1788_v31 = vld [vmem:[%s2264_s4 + $0x20] sm:$0xff]  ;;  %v1876_v43 = vld [vmem:[%s2264_s4 + $0x38] sm:$0xff]  ;;  %v1875_v16 = vld [vmem:[%s2264_s4 + $0x30] sm:$0xff] }
  0x2c   : > { %832 = vmatpush.msrb.mxu1 %v282_v15  ;;  %1703 = vmatmul.msk.f32.vlgmr.msra.gmra.mxu3 %vm285_vm0, %v2275_v2 }
  0x2d   : > { %938 = vmatpush.msrb.mxu2 %v1789_v21  ;;  %1057 = vmatpush.msrb.mxu3 %v281_v14 }
  0x2e   : > { %1651 = vmatmul.msk.f32.gmra.mxu0 %vm285_vm0, %v2282_v3  ;;  %833 = vmatpush.msrb.mxu1 %v280_v18 }
  0x2f   : > { %1125 = vmatpush.msra.mxu0 %v282_v15  ;;  %1058 = vmatpush.msrb.mxu3 %v279_v17 }
  0x30   : > { %939 = vmatpush.msrb.mxu2 %v1788_v31 }
  0x31   : > { %1126 = vmatpush.msra.mxu0 %v280_v18  ;;  %1418 = vmatpush.msra.mxu3 %v282_v15 }
  0x33   : > { %1419 = vmatpush.msra.mxu3 %v280_v18 }
  0x34   : > { %1704 = vmatmul.msk.f32.gmra.mxu3 %vm285_vm0, %v2282_v3 }
  0x36   : > { %1652 = vmatmul.msk.f32.gmra.mxu0 %vm285_vm0, %v2289_v4 }
  0x3c   : > { %1705 = vmatmul.msk.f32.gmra.mxu3 %vm285_vm0, %v2289_v4 }
  0x3e   : > { %1653 = vmatmul.msk.f32.gmra.mxu0 %vm285_vm0, %v2296_v5 }
  0x44   : > { %1706 = vmatmul.msk.f32.gmra.mxu3 %vm285_vm0, %v2296_v5 }
  0x46   : > { %1654 = vmatmul.msk.f32.gmra.mxu0 %vm285_vm0, %v2303_v6 }
  0x4c   : > { %1707 = vmatmul.msk.f32.gmra.mxu3 %vm285_vm0, %v2303_v6 }
  0x4e   : > { %1655 = vmatmul.msk.f32.gmra.mxu0 %vm285_vm0, %v2310_v7 }
  0x54   : > { %1708 = vmatmul.msk.f32.gmra.mxu3 %vm285_vm0, %v2310_v7 }
  0x56   : > { %1656 = vmatmul.msk.f32.gmra.mxu0 %vm285_vm0, %v2317_v8 }
  0x5c   : > { %1709 = vmatmul.msk.f32.gmra.mxu3 %vm285_vm0, %v2317_v8 }
  0x5e   : > { %1657 = vmatmul.msk.f32.gmra.mxu0 %vm285_vm0, %v2324_v9 }
  0x64   : > { %1710 = vmatmul.msk.f32.gmra.mxu3 %vm285_vm0, %v2324_v9 }
  0x66   : > { %1658 = vmatmul.msk.f32.gmra.mxu0 %vm285_vm0, %v2331_v10 }
  0x6c   : > { %1711 = vmatmul.msk.f32.gmra.mxu3 %vm285_vm0, %v2331_v10 }
  0x6e   : > { %1659 = vmatmul.msk.f32.gmra.mxu0 %vm285_vm0, %v2338_v11 }
  0x74   : > { %1712 = vmatmul.msk.f32.gmra.mxu3 %vm285_vm0, %v2338_v11 }
  0x76   : > { %1660 = vmatmul.msk.f32.gmra.mxu0 %vm285_vm0, %v2345_v12 }
  0x7c   : > { %1713 = vmatmul.msk.f32.gmra.mxu3 %vm285_vm0, %v2345_v12 }
  0x7e   : > { %1661 = vmatmul.msk.f32.gmra.mxu0 %vm285_vm0, %v2352_v13 }
  0x84   : > { %1714 = vmatmul.msk.f32.gmra.mxu3 %vm285_vm0, %v2352_v13 }
  0x86   : > { %1662 = vmatmul.msk.f32.gmra.mxu0 %vm285_vm0, %v2361_v20 }
  0x8c   : > { %1715 = vmatmul.msk.f32.gmra.mxu3 %vm285_vm0, %v2361_v20 }
  0x8e   : > { %1663 = vmatmul.msk.f32.gmra.mxu0 %vm285_vm0, %v2371_v22 }
  0x94   : > { %1716 = vmatmul.msk.f32.gmra.mxu3 %vm285_vm0, %v2371_v22 }
  0x96   : > { %1664 = vmatmul.msk.f32.gmra.mxu0 %vm285_vm0, %v2380_v23 }
  0x9c   : > { %1717 = vmatmul.msk.f32.gmra.mxu3 %vm285_vm0, %v2380_v23 }
  0x9e   : > { %1665 = vmatmul.msk.f32.gmra.mxu0 %vm285_vm0, %v2389_v24 }
  0xa3   : > { %v354_v25 = vpop.f32.mrf.mxu0 }
  0xa4   : > { %1667 = vmatmul.msk.f32.vlgmr.msra.gmra.mxu1 %vm285_vm0, %v354_v25  ;;  %1684 = vmatmul.msk.f32.vlgmr.msra.gmra.mxu2 %vm285_vm0, %v354_v25 }
  0xa5   : > { %1350 = vmatpush.msra.mxu2 %v281_v14  ;;  %1718 = vmatmul.msk.f32.gmra.mxu3 %vm285_vm0, %v2389_v24 }
  0xa6   : > { %1666 = vmatmul.msk.f32.gmra.mxu0 %vm285_vm0, %v2398_v26  ;;  %1231 = vmatpush.msra.mxu1 %v1876_v43 }
  0xa7   : > { %1351 = vmatpush.msra.mxu2 %v279_v17 }
  0xa8   : > { %1232 = vmatpush.msra.mxu1 %v1875_v16 }
  0xab   : > { %v357_v27 = vpop.f32.mrf.mxu0 }
  0xac   : > { %1668 = vmatmul.msk.f32.gmra.mxu1 %vm285_vm0, %v357_v27  ;;  %1685 = vmatmul.msk.f32.gmra.mxu2 %vm285_vm0, %v357_v27 }
  0xad   : > { %1719 = vmatmul.msk.f32.gmra.mxu3 %vm285_vm0, %v2398_v26 }
  0xaf   : > { %v648_v40 = vpop.f32.mrf.mxu3 }
  0xb0   : > { %1720 = vmatmul.msk.f32.vlgmr.msrb.gmra.mxu0 %vm285_vm0, %v648_v40 }
  0xb3   : > { %v360_v28 = vpop.f32.mrf.mxu0 }
  0xb4   : > { %1669 = vmatmul.msk.f32.gmra.mxu1 %vm285_vm0, %v360_v28  ;;  %1686 = vmatmul.msk.f32.gmra.mxu2 %vm285_vm0, %v360_v28 }
  0xb7   : > { %v651_v42 = vpop.f32.mrf.mxu3 }
  0xb8   : > { %1721 = vmatmul.msk.f32.gmra.mxu0 %vm285_vm0, %v651_v42 }
  0xbb   : > { %v363_v29 = vpop.f32.mrf.mxu0 }
  0xbc   : > { %1670 = vmatmul.msk.f32.gmra.mxu1 %vm285_vm0, %v363_v29  ;;  %1687 = vmatmul.msk.f32.gmra.mxu2 %vm285_vm0, %v363_v29 }
  0xbf   : > { %v654_v45 = vpop.f32.mrf.mxu3 }
  0xc0   : > { %1722 = vmatmul.msk.f32.gmra.mxu0 %vm285_vm0, %v654_v45 }
  0xc3   : > { %v366_v30 = vpop.f32.mrf.mxu0 }
  0xc4   : > { %1671 = vmatmul.msk.f32.gmra.mxu1 %vm285_vm0, %v366_v30  ;;  %1688 = vmatmul.msk.f32.gmra.mxu2 %vm285_vm0, %v366_v30 }
  0xc7   : > { %v657_v47 = vpop.f32.mrf.mxu3 }
  0xc8   : > { %1723 = vmatmul.msk.f32.gmra.mxu0 %vm285_vm0, %v657_v47 }
  0xcb   : > { %v369_v32 = vpop.f32.mrf.mxu0 }
  0xcc   : > { %1672 = vmatmul.msk.f32.gmra.mxu1 %vm285_vm0, %v369_v32  ;;  %1689 = vmatmul.msk.f32.gmra.mxu2 %vm285_vm0, %v369_v32 }
  0xcf   : > { %v660_v51 = vpop.f32.mrf.mxu3 }
  0xd0   : > { %1724 = vmatmul.msk.f32.gmra.mxu0 %vm285_vm0, %v660_v51 }
  0xd3   : > { %v372_v33 = vpop.f32.mrf.mxu0 }
  0xd4   : > { %1673 = vmatmul.msk.f32.gmra.mxu1 %vm285_vm0, %v372_v33  ;;  %1690 = vmatmul.msk.f32.gmra.mxu2 %vm285_vm0, %v372_v33 }
  0xd7   : > { %v663_v54 = vpop.f32.mrf.mxu3 }
  0xd8   : > { %1725 = vmatmul.msk.f32.gmra.mxu0 %vm285_vm0, %v663_v54 }
  0xdb   : > { %v375_v34 = vpop.f32.mrf.mxu0 }
  0xdc   : > { %1674 = vmatmul.msk.f32.gmra.mxu1 %vm285_vm0, %v375_v34  ;;  %1691 = vmatmul.msk.f32.gmra.mxu2 %vm285_vm0, %v375_v34 }
  0xdf   : > { %v666_v57 = vpop.f32.mrf.mxu3 }
  0xe0   : > { %1726 = vmatmul.msk.f32.gmra.mxu0 %vm285_vm0, %v666_v57 }
  0xe3   : > { %v378_v35 = vpop.f32.mrf.mxu0 }
  0xe4   : > { %1675 = vmatmul.msk.f32.gmra.mxu1 %vm285_vm0, %v378_v35  ;;  %1692 = vmatmul.msk.f32.gmra.mxu2 %vm285_vm0, %v378_v35 }
  0xe7   : > { %v669_v60 = vpop.f32.mrf.mxu3 }
  0xe8   : > { %1727 = vmatmul.msk.f32.gmra.mxu0 %vm285_vm0, %v669_v60 }
  0xeb   : > { %v381_v36 = vpop.f32.mrf.mxu0 }
  0xec   : > { %1676 = vmatmul.msk.f32.gmra.mxu1 %vm285_vm0, %v381_v36  ;;  %1693 = vmatmul.msk.f32.gmra.mxu2 %vm285_vm0, %v381_v36 }
  0xef   : > { %v672_v63 = vpop.f32.mrf.mxu3 }
  0xf0   : > { %1728 = vmatmul.msk.f32.gmra.mxu0 %vm285_vm0, %v672_v63 }
  0xf3   : > { %v384_v37 = vpop.f32.mrf.mxu0 }
  0xf4   : > { %1677 = vmatmul.msk.f32.gmra.mxu1 %vm285_vm0, %v384_v37  ;;  %1694 = vmatmul.msk.f32.gmra.mxu2 %vm285_vm0, %v384_v37 }
  0xf7   : > { %v675_v14 = vpop.f32.mrf.mxu3 }
  0xf8   : > { %1729 = vmatmul.msk.f32.gmra.mxu0 %vm285_vm0, %v675_v14 }
  0xfb   : > { %v387_v38 = vpop.f32.mrf.mxu0 }
  0xfc   : > { %1678 = vmatmul.msk.f32.gmra.mxu1 %vm285_vm0, %v387_v38  ;;  %1695 = vmatmul.msk.f32.gmra.mxu2 %vm285_vm0, %v387_v38 }
  0xff   : > { %v678_v18 = vpop.f32.mrf.mxu3 }
 0x100   : > { %1730 = vmatmul.msk.f32.gmra.mxu0 %vm285_vm0, %v678_v18 }
 0x103   : > { %v390_v39 = vpop.f32.mrf.mxu0 }
 0x104   : > { %1679 = vmatmul.msk.f32.gmra.mxu1 %vm285_vm0, %v390_v39  ;;  %1696 = vmatmul.msk.f32.gmra.mxu2 %vm285_vm0, %v390_v39 }
 0x107   : > { %v681_v25 = vpop.f32.mrf.mxu3 }
 0x108   : > { %1731 = vmatmul.msk.f32.gmra.mxu0 %vm285_vm0, %v681_v25 }
 0x10b   : > { %v393_v41 = vpop.f32.mrf.mxu0 }
 0x10c   : > { %1680 = vmatmul.msk.f32.gmra.mxu1 %vm285_vm0, %v393_v41  ;;  %1697 = vmatmul.msk.f32.gmra.mxu2 %vm285_vm0, %v393_v41 }
 0x10f   : > { %v684_v29 = vpop.f32.mrf.mxu3 }
 0x110   : > { %1732 = vmatmul.msk.f32.gmra.mxu0 %vm285_vm0, %v684_v29 }
 0x113   : > { %v396_v44 = vpop.f32.mrf.mxu0 }
 0x114   : > { %1681 = vmatmul.msk.f32.gmra.mxu1 %vm285_vm0, %v396_v44  ;;  %1698 = vmatmul.msk.f32.gmra.mxu2 %vm285_vm0, %v396_v44 }
 0x117   : > { %v687_v32 = vpop.f32.mrf.mxu3 }
 0x118   : > { %1733 = vmatmul.msk.f32.gmra.mxu0 %vm285_vm0, %v687_v32 }
 0x11b   : > { %v399_v46 = vpop.f32.mrf.mxu0 }
 0x11c   : > { %1682 = vmatmul.msk.f32.gmra.mxu1 %vm285_vm0, %v399_v46  ;;  %1699 = vmatmul.msk.f32.gmra.mxu2 %vm285_vm0, %v399_v46 }
 0x11f   : > { %v690_v35 = vpop.f32.mrf.mxu3 }
 0x120   : > { %1734 = vmatmul.msk.f32.gmra.mxu0 %vm285_vm0, %v690_v35 }
 0x121   : > { %v473_v48 = vpop.f32.mrf.mxu1 }
 0x122   : > { %592 = vst [vmem:[%s2469_s30] sm:$0xff] %v473_v48 }
 0x123   : > { %v402_v49 = vpop.f32.mrf.mxu0 }
 0x124   : > { %1683 = vmatmul.msk.f32.gmra.mxu1 %vm285_vm0, %v402_v49  ;;  %1700 = vmatmul.msk.f32.gmra.mxu2 %vm285_vm0, %v402_v49 }
 0x127   : > { %v541_v50 = vpop.f32.mrf.mxu2 }
 0x128   : > { %594 = vst.msk [vmem:[%s2469_s30 + $0x8] sm:$0xff] %vm593_vm1, %v541_v50  ;;  %v693_v38 = vpop.f32.mrf.mxu3 }
 0x129   : > { %v476_v52 = vpop.f32.mrf.mxu1  ;;  %1735 = vmatmul.msk.f32.gmra.mxu0 %vm285_vm0, %v693_v38 }
 0x12a   : > { %595 = vst [vmem:[%s2469_s30 + $0x10] sm:$0xff] %v476_v52 }
 0x12c   : > { %1790 = vmatmul.msk.f32.vlgmr.msrb.gmra.mxu2 %vm285_vm0, %v2275_v2  ;;  %1737 = vmatmul.msk.f32.vlgmr.msrb.gmra.mxu1 %vm285_vm0, %v648_v40 }
 0x12d   : > { %v767_v40 = vpop.f32.mrf.mxu0 }
 0x12e   : > { %1754 = vst [vmem:[%s2469_s30 + $0x110] sm:$0xff] %v767_v40 }
 0x12f   : > { %v544_v53 = vpop.f32.mrf.mxu2 }
 0x130   : > { %596 = vst.msk [vmem:[%s2469_s30 + $0x18] sm:$0xff] %vm593_vm1, %v544_v53 }
 0x131   : > { %v479_v55 = vpop.f32.mrf.mxu1 }
 0x132   : > { %597 = vst [vmem:[%s2469_s30 + $0x20] sm:$0xff] %v479_v55 }
 0x134   : > { %1791 = vmatmul.msk.f32.gmra.mxu2 %vm285_vm0, %v2282_v3  ;;  %1738 = vmatmul.msk.f32.gmra.mxu1 %vm285_vm0, %v651_v42  ;;  %v696_v42 = vpop.f32.mrf.mxu3 }
 0x135   : > { %1736 = vmatmul.msk.f32.gmra.mxu0 %vm285_vm0, %v696_v42  ;;  %v770_v44 = vpop.f32.mrf.mxu0 }
 0x136   : > { %1756 = vst [vmem:[%s2469_s30 + $0x120] sm:$0xff] %v770_v44 }
 0x137   : > { %v547_v56 = vpop.f32.mrf.mxu2 }
 0x138   : > { %598 = vst.msk [vmem:[%s2469_s30 + $0x28] sm:$0xff] %vm593_vm1, %v547_v56 }
 0x139   : > { %v482_v58 = vpop.f32.mrf.mxu1 }
 0x13a   : > { %599 = vst [vmem:[%s2469_s30 + $0x30] sm:$0xff] %v482_v58 }
 0x13c   : > { %1792 = vmatmul.msk.f32.gmra.mxu2 %vm285_vm0, %v2289_v4  ;;  %1739 = vmatmul.msk.f32.gmra.mxu1 %vm285_vm0, %v654_v45 }
 0x13f   : > { %v550_v59 = vpop.f32.mrf.mxu2 }
 0x140   : > { %600 = vst.msk [vmem:[%s2469_s30 + $0x38] sm:$0xff] %vm593_vm1, %v550_v59 }
 0x141   : > { %v485_v61 = vpop.f32.mrf.mxu1 }
 0x142   : > { %601 = vst [vmem:[%s2469_s30 + $0x40] sm:$0xff] %v485_v61 }
 0x144   : > { %1793 = vmatmul.msk.f32.gmra.mxu2 %vm285_vm0, %v2296_v5  ;;  %1740 = vmatmul.msk.f32.gmra.mxu1 %vm285_vm0, %v657_v47  ;;  %v773_v47 = vpop.f32.mrf.mxu0 }
 0x145   : > { %1758 = vst [vmem:[%s2469_s30 + $0x130] sm:$0xff] %v773_v47 }
 0x147   : > { %v553_v62 = vpop.f32.mrf.mxu2 }
 0x148   : > { %602 = vst.msk [vmem:[%s2469_s30 + $0x48] sm:$0xff] %vm593_vm1, %v553_v62 }
 0x149   : > { %v488_v0 = vpop.f32.mrf.mxu1 }
 0x14a   : > { %603 = vst [vmem:[%s2469_s30 + $0x50] sm:$0xff] %v488_v0 }
 0x14c   : > { %1794 = vmatmul.msk.f32.gmra.mxu2 %vm285_vm0, %v2303_v6  ;;  %1741 = vmatmul.msk.f32.gmra.mxu1 %vm285_vm0, %v660_v51  ;;  %v776_v50 = vpop.f32.mrf.mxu0 }
 0x14d   : > { %1760 = vst [vmem:[%s2469_s30 + $0x140] sm:$0xff] %v776_v50 }
 0x14f   : > { %v556_v1 = vpop.f32.mrf.mxu2 }
 0x150   : > { %604 = vst.msk [vmem:[%s2469_s30 + $0x58] sm:$0xff] %vm593_vm1, %v556_v1 }
 0x151   : > { %v491_v15 = vpop.f32.mrf.mxu1 }
 0x152   : > { %605 = vst [vmem:[%s2469_s30 + $0x60] sm:$0xff] %v491_v15 }
 0x154   : > { %1795 = vmatmul.msk.f32.gmra.mxu2 %vm285_vm0, %v2310_v7  ;;  %1742 = vmatmul.msk.f32.gmra.mxu1 %vm285_vm0, %v663_v54  ;;  %v779_v53 = vpop.f32.mrf.mxu0 }
 0x155   : > { %1762 = vst [vmem:[%s2469_s30 + $0x150] sm:$0xff] %v779_v53 }
 0x157   : > { %v559_v17 = vpop.f32.mrf.mxu2 }
 0x158   : > { %606 = vst.msk [vmem:[%s2469_s30 + $0x68] sm:$0xff] %vm593_vm1, %v559_v17 }
 0x159   : > { %v494_v19 = vpop.f32.mrf.mxu1 }
 0x15a   : > { %607 = vst [vmem:[%s2469_s30 + $0x70] sm:$0xff] %v494_v19 }
 0x15c   : > { %1796 = vmatmul.msk.f32.gmra.mxu2 %vm285_vm0, %v2317_v8  ;;  %1743 = vmatmul.msk.f32.gmra.mxu1 %vm285_vm0, %v666_v57  ;;  %v782_v56 = vpop.f32.mrf.mxu0 }
 0x15d   : > { %1764 = vst [vmem:[%s2469_s30 + $0x160] sm:$0xff] %v782_v56 }
 0x15f   : > { %v562_v21 = vpop.f32.mrf.mxu2 }
 0x160   : > { %608 = vst.msk [vmem:[%s2469_s30 + $0x78] sm:$0xff] %vm593_vm1, %v562_v21 }
 0x161   : > { %v497_v27 = vpop.f32.mrf.mxu1 }
 0x162   : > { %609 = vst [vmem:[%s2469_s30 + $0x80] sm:$0xff] %v497_v27 }
 0x164   : > { %1797 = vmatmul.msk.f32.gmra.mxu2 %vm285_vm0, %v2324_v9  ;;  %1744 = vmatmul.msk.f32.gmra.mxu1 %vm285_vm0, %v669_v60  ;;  %v785_v59 = vpop.f32.mrf.mxu0 }
 0x165   : > { %1766 = vst [vmem:[%s2469_s30 + $0x170] sm:$0xff] %v785_v59 }
 0x167   : > { %v565_v28 = vpop.f32.mrf.mxu2 }
 0x168   : > { %610 = vst.msk [vmem:[%s2469_s30 + $0x88] sm:$0xff] %vm593_vm1, %v565_v28 }
 0x169   : > { %v500_v30 = vpop.f32.mrf.mxu1 }
 0x16a   : > { %611 = vst [vmem:[%s2469_s30 + $0x90] sm:$0xff] %v500_v30 }
 0x16c   : > { %1798 = vmatmul.msk.f32.gmra.mxu2 %vm285_vm0, %v2331_v10  ;;  %1745 = vmatmul.msk.f32.gmra.mxu1 %vm285_vm0, %v672_v63  ;;  %v788_v62 = vpop.f32.mrf.mxu0 }
 0x16d   : > { %1768 = vst [vmem:[%s2469_s30 + $0x180] sm:$0xff] %v788_v62 }
 0x16f   : > { %v568_v31 = vpop.f32.mrf.mxu2 }
 0x170   : > { %612 = vst.msk [vmem:[%s2469_s30 + $0x98] sm:$0xff] %vm593_vm1, %v568_v31 }
 0x171   : > { %v503_v33 = vpop.f32.mrf.mxu1 }
 0x172   : > { %613 = vst [vmem:[%s2469_s30 + $0xa0] sm:$0xff] %v503_v33 }
 0x174   : > { %1799 = vmatmul.msk.f32.gmra.mxu2 %vm285_vm0, %v2338_v11  ;;  %1746 = vmatmul.msk.f32.gmra.mxu1 %vm285_vm0, %v675_v14  ;;  %v791_v0 = vpop.f32.mrf.mxu0 }
 0x175   : > { %1770 = vst [vmem:[%s2469_s30 + $0x190] sm:$0xff] %v791_v0 }
 0x177   : > { %v571_v34 = vpop.f32.mrf.mxu2 }
 0x178   : > { %614 = vst.msk [vmem:[%s2469_s30 + $0xa8] sm:$0xff] %vm593_vm1, %v571_v34 }
 0x179   : > { %v506_v36 = vpop.f32.mrf.mxu1 }
 0x17a   : > { %615 = vst [vmem:[%s2469_s30 + $0xb0] sm:$0xff] %v506_v36 }
 0x17c   : > { %1800 = vmatmul.msk.f32.gmra.mxu2 %vm285_vm0, %v2345_v12  ;;  %1747 = vmatmul.msk.f32.gmra.mxu1 %vm285_vm0, %v678_v18  ;;  %v794_v14 = vpop.f32.mrf.mxu0 }
 0x17d   : > { %1772 = vst [vmem:[%s2469_s30 + $0x1a0] sm:$0xff] %v794_v14 }
 0x17f   : > { %v574_v37 = vpop.f32.mrf.mxu2 }
 0x180   : > { %616 = vst.msk [vmem:[%s2469_s30 + $0xb8] sm:$0xff] %vm593_vm1, %v574_v37 }
 0x181   : > { %v509_v39 = vpop.f32.mrf.mxu1 }
 0x182   : > { %617 = vst [vmem:[%s2469_s30 + $0xc0] sm:$0xff] %v509_v39 }
 0x184   : > { %1801 = vmatmul.msk.f32.gmra.mxu2 %vm285_vm0, %v2352_v13  ;;  %1748 = vmatmul.msk.f32.gmra.mxu1 %vm285_vm0, %v681_v25  ;;  %v797_v16 = vpop.f32.mrf.mxu0 }
 0x185   : > { %1774 = vst [vmem:[%s2469_s30 + $0x1b0] sm:$0xff] %v797_v16 }
 0x187   : > { %v577_v41 = vpop.f32.mrf.mxu2 }
 0x188   : > { %618 = vst.msk [vmem:[%s2469_s30 + $0xc8] sm:$0xff] %vm593_vm1, %v577_v41 }
 0x189   : > { %v512_v43 = vpop.f32.mrf.mxu1 }
 0x18a   : > { %619 = vst [vmem:[%s2469_s30 + $0xd0] sm:$0xff] %v512_v43 }
 0x18c   : > { %1802 = vmatmul.msk.f32.gmra.mxu2 %vm285_vm0, %v2361_v20  ;;  %1749 = vmatmul.msk.f32.gmra.mxu1 %vm285_vm0, %v684_v29  ;;  %v800_v18 = vpop.f32.mrf.mxu0 }
 0x18d   : > { %1776 = vst [vmem:[%s2469_s30 + $0x1c0] sm:$0xff] %v800_v18 }
 0x18f   : > { %v580_v45 = vpop.f32.mrf.mxu2 }
 0x190   : > { %620 = vst.msk [vmem:[%s2469_s30 + $0xd8] sm:$0xff] %vm593_vm1, %v580_v45 }
 0x191   : > { %v515_v46 = vpop.f32.mrf.mxu1 }
 0x192   : > { %621 = vst [vmem:[%s2469_s30 + $0xe0] sm:$0xff] %v515_v46 }
 0x194   : > { %1803 = vmatmul.msk.f32.gmra.mxu2 %vm285_vm0, %v2371_v22  ;;  %1750 = vmatmul.msk.f32.gmra.mxu1 %vm285_vm0, %v687_v32  ;;  %v803_v21 = vpop.f32.mrf.mxu0 }
 0x195   : > { %1778 = vst [vmem:[%s2469_s30 + $0x1d0] sm:$0xff] %v803_v21 }
 0x197   : > { %v583_v48 = vpop.f32.mrf.mxu2 }
 0x198   : > { %622 = vst.msk [vmem:[%s2469_s30 + $0xe8] sm:$0xff] %vm593_vm1, %v583_v48 }
 0x199   : > { %v518_v49 = vpop.f32.mrf.mxu1 }
 0x19a   : > { %623 = vst [vmem:[%s2469_s30 + $0xf0] sm:$0xff] %v518_v49 }
 0x19c   : > { %1804 = vmatmul.msk.f32.gmra.mxu2 %vm285_vm0, %v2380_v23  ;;  %1751 = vmatmul.msk.f32.gmra.mxu1 %vm285_vm0, %v690_v35  ;;  %v806_v27 = vpop.f32.mrf.mxu0 }
 0x19d   : > { %1780 = vst [vmem:[%s2469_s30 + $0x1e0] sm:$0xff] %v806_v27 }
 0x19f   : > { %v586_v51 = vpop.f32.mrf.mxu2 }
 0x1a0   : > { %624 = vst.msk [vmem:[%s2469_s30 + $0xf8] sm:$0xff] %vm593_vm1, %v586_v51 }
 0x1a1   : > { %v521_v52 = vpop.f32.mrf.mxu1 }
 0x1a2   : > { %625 = vst [vmem:[%s2469_s30 + $0x100] sm:$0xf] %v521_v52 }
 0x1a4   : > { %1805 = vmatmul.msk.f32.gmra.mxu2 %vm285_vm0, %v2389_v24  ;;  %1752 = vmatmul.msk.f32.gmra.mxu1 %vm285_vm0, %v693_v38  ;;  %v809_v29 = vpop.f32.mrf.mxu0 }
 0x1a5   : > { %1782 = vst [vmem:[%s2469_s30 + $0x1f0] sm:$0xff] %v809_v29 }
 0x1a7   : > { %v589_v54 = vpop.f32.mrf.mxu2 }
 0x1a8   : > { %627 = vst.msk [vmem:[%s2469_s30 + $0x108] sm:$0xf] %vm626_vm2, %v589_v54 }
 0x1a9   : > { %v835_v55 = vpop.f32.mrf.mxu1 }
 0x1aa   : > { %1755 = vst.msk [vmem:[%s2469_s30 + $0x118] sm:$0xff] %vm593_vm1, %v835_v55 }
 0x1ac   : > { %1806 = vmatmul.msk.f32.gmra.mxu2 %vm285_vm0, %v2398_v26  ;;  %1753 = vmatmul.msk.f32.gmra.mxu1 %vm285_vm0, %v696_v42  ;;  %v812_v31 = vpop.f32.mrf.mxu0 }
 0x1ad   : > { %1784 = vst [vmem:[%s2469_s30 + $0x200] sm:$0xff] %v812_v31 }
 0x1af   : > { %v941_v57 = vpop.f32.mrf.mxu2 }
 0x1b0   : > { %1807 = vmatmul.msk.f32.vlgmr.msrb.gmra.mxu3 %vm285_vm0, %v941_v57  ;;  %1824 = vmatmul.msk.f32.vlgmr.msra.gmra.mxu0 %vm285_vm0, %v941_v57 }
 0x1b1   : > { %v838_v58 = vpop.f32.mrf.mxu1 }
 0x1b2   : > { %1757 = vst.msk [vmem:[%s2469_s30 + $0x128] sm:$0xff] %vm593_vm1, %v838_v58 }
 0x1b4   : > { %1877 = vmatmul.msk.f32.vlgmr.msra.gmra.mxu1 %vm285_vm0, %v2275_v2  ;;  %v815_v33 = vpop.f32.mrf.mxu0 }
 0x1b5   : > { %1786 = vst [vmem:[%s2469_s30 + $0x210] sm:$0xf] %v815_v33 }
 0x1b7   : > { %v944_v60 = vpop.f32.mrf.mxu2 }
 0x1b8   : > { %1808 = vmatmul.msk.f32.gmra.mxu3 %vm285_vm0, %v944_v60  ;;  %1825 = vmatmul.msk.f32.gmra.mxu0 %vm285_vm0, %v944_v60 }
 0x1b9   : > { %v841_v61 = vpop.f32.mrf.mxu1 }
 0x1ba   : > { %1759 = vst.msk [vmem:[%s2469_s30 + $0x138] sm:$0xff] %vm593_vm1, %v841_v61 }
 0x1bc   : > { %1878 = vmatmul.msk.f32.gmra.mxu1 %vm285_vm0, %v2282_v3 }
 0x1bf   : > { %v947_v63 = vpop.f32.mrf.mxu2 }
 0x1c0   : > { %1809 = vmatmul.msk.f32.gmra.mxu3 %vm285_vm0, %v947_v63  ;;  %1826 = vmatmul.msk.f32.gmra.mxu0 %vm285_vm0, %v947_v63 }
 0x1c1   : > { %v844_v2 = vpop.f32.mrf.mxu1 }
 0x1c2   : > { %1761 = vst.msk [vmem:[%s2469_s30 + $0x148] sm:$0xff] %vm593_vm1, %v844_v2 }
 0x1c4   : > { %1879 = vmatmul.msk.f32.gmra.mxu1 %vm285_vm0, %v2289_v4 }
 0x1c7   : > { %v950_v1 = vpop.f32.mrf.mxu2 }
 0x1c8   : > { %1810 = vmatmul.msk.f32.gmra.mxu3 %vm285_vm0, %v950_v1  ;;  %1827 = vmatmul.msk.f32.gmra.mxu0 %vm285_vm0, %v950_v1 }
 0x1c9   : > { %v847_v3 = vpop.f32.mrf.mxu1 }
 0x1ca   : > { %1763 = vst.msk [vmem:[%s2469_s30 + $0x158] sm:$0xff] %vm593_vm1, %v847_v3 }
 0x1cc   : > { %1880 = vmatmul.msk.f32.gmra.mxu1 %vm285_vm0, %v2296_v5 }
 0x1cf   : > { %v953_v15 = vpop.f32.mrf.mxu2 }
 0x1d0   : > { %1811 = vmatmul.msk.f32.gmra.mxu3 %vm285_vm0, %v953_v15  ;;  %1828 = vmatmul.msk.f32.gmra.mxu0 %vm285_vm0, %v953_v15 }
 0x1d1   : > { %v850_v4 = vpop.f32.mrf.mxu1 }
 0x1d2   : > { %1765 = vst.msk [vmem:[%s2469_s30 + $0x168] sm:$0xff] %vm593_vm1, %v850_v4 }
 0x1d4   : > { %1881 = vmatmul.msk.f32.gmra.mxu1 %vm285_vm0, %v2303_v6 }
 0x1d7   : > { %v956_v17 = vpop.f32.mrf.mxu2 }
 0x1d8   : > { %1812 = vmatmul.msk.f32.gmra.mxu3 %vm285_vm0, %v956_v17  ;;  %1829 = vmatmul.msk.f32.gmra.mxu0 %vm285_vm0, %v956_v17 }
 0x1d9   : > { %v853_v5 = vpop.f32.mrf.mxu1 }
 0x1da   : > { %1767 = vst.msk [vmem:[%s2469_s30 + $0x178] sm:$0xff] %vm593_vm1, %v853_v5 }
 0x1dc   : > { %1882 = vmatmul.msk.f32.gmra.mxu1 %vm285_vm0, %v2310_v7 }
 0x1df   : > { %v959_v19 = vpop.f32.mrf.mxu2 }
 0x1e0   : > { %1813 = vmatmul.msk.f32.gmra.mxu3 %vm285_vm0, %v959_v19  ;;  %1830 = vmatmul.msk.f32.gmra.mxu0 %vm285_vm0, %v959_v19 }
 0x1e1   : > { %v856_v6 = vpop.f32.mrf.mxu1 }
 0x1e2   : > { %1769 = vst.msk [vmem:[%s2469_s30 + $0x188] sm:$0xff] %vm593_vm1, %v856_v6 }
 0x1e4   : > { %1883 = vmatmul.msk.f32.gmra.mxu1 %vm285_vm0, %v2317_v8 }
 0x1e7   : > { %v962_v25 = vpop.f32.mrf.mxu2 }
 0x1e8   : > { %1814 = vmatmul.msk.f32.gmra.mxu3 %vm285_vm0, %v962_v25  ;;  %1831 = vmatmul.msk.f32.gmra.mxu0 %vm285_vm0, %v962_v25 }
 0x1e9   : > { %v859_v7 = vpop.f32.mrf.mxu1 }
 0x1ea   : > { %1771 = vst.msk [vmem:[%s2469_s30 + $0x198] sm:$0xff] %vm593_vm1, %v859_v7 }
 0x1ec   : > { %1884 = vmatmul.msk.f32.gmra.mxu1 %vm285_vm0, %v2324_v9 }
 0x1ef   : > { %v965_v28 = vpop.f32.mrf.mxu2 }
 0x1f0   : > { %1815 = vmatmul.msk.f32.gmra.mxu3 %vm285_vm0, %v965_v28  ;;  %1832 = vmatmul.msk.f32.gmra.mxu0 %vm285_vm0, %v965_v28 }
 0x1f1   : > { %v862_v8 = vpop.f32.mrf.mxu1 }
 0x1f2   : > { %1773 = vst.msk [vmem:[%s2469_s30 + $0x1a8] sm:$0xff] %vm593_vm1, %v862_v8 }
 0x1f4   : > { %1885 = vmatmul.msk.f32.gmra.mxu1 %vm285_vm0, %v2331_v10 }
 0x1f7   : > { %v968_v30 = vpop.f32.mrf.mxu2 }
 0x1f8   : > { %1816 = vmatmul.msk.f32.gmra.mxu3 %vm285_vm0, %v968_v30  ;;  %1833 = vmatmul.msk.f32.gmra.mxu0 %vm285_vm0, %v968_v30 }
 0x1f9   : > { %v865_v9 = vpop.f32.mrf.mxu1 }
 0x1fa   : > { %1775 = vst.msk [vmem:[%s2469_s30 + $0x1b8] sm:$0xff] %vm593_vm1, %v865_v9 }
 0x1fc   : > { %1886 = vmatmul.msk.f32.gmra.mxu1 %vm285_vm0, %v2338_v11 }
 0x1ff   : > { %v971_v32 = vpop.f32.mrf.mxu2 }
 0x200   : > { %1817 = vmatmul.msk.f32.gmra.mxu3 %vm285_vm0, %v971_v32  ;;  %1834 = vmatmul.msk.f32.gmra.mxu0 %vm285_vm0, %v971_v32 }
 0x201   : > { %v868_v10 = vpop.f32.mrf.mxu1 }
 0x202   : > { %1777 = vst.msk [vmem:[%s2469_s30 + $0x1c8] sm:$0xff] %vm593_vm1, %v868_v10 }
 0x204   : > { %1887 = vmatmul.msk.f32.gmra.mxu1 %vm285_vm0, %v2345_v12 }
 0x207   : > { %v974_v34 = vpop.f32.mrf.mxu2 }
 0x208   : > { %1818 = vmatmul.msk.f32.gmra.mxu3 %vm285_vm0, %v974_v34  ;;  %1835 = vmatmul.msk.f32.gmra.mxu0 %vm285_vm0, %v974_v34 }
 0x209   : > { %v871_v11 = vpop.f32.mrf.mxu1 }
 0x20a   : > { %1779 = vst.msk [vmem:[%s2469_s30 + $0x1d8] sm:$0xff] %vm593_vm1, %v871_v11 }
 0x20c   : > { %1888 = vmatmul.msk.f32.gmra.mxu1 %vm285_vm0, %v2352_v13 }
 0x20f   : > { %v977_v35 = vpop.f32.mrf.mxu2 }
 0x210   : > { %1819 = vmatmul.msk.f32.gmra.mxu3 %vm285_vm0, %v977_v35  ;;  %1836 = vmatmul.msk.f32.gmra.mxu0 %vm285_vm0, %v977_v35 }
 0x211   : > { %v874_v12 = vpop.f32.mrf.mxu1 }
 0x212   : > { %1781 = vst.msk [vmem:[%s2469_s30 + $0x1e8] sm:$0xff] %vm593_vm1, %v874_v12 }
 0x214   : > { %1889 = vmatmul.msk.f32.gmra.mxu1 %vm285_vm0, %v2361_v20 }
 0x217   : > { %v980_v36 = vpop.f32.mrf.mxu2 }
 0x218   : > { %1820 = vmatmul.msk.f32.gmra.mxu3 %vm285_vm0, %v980_v36  ;;  %1837 = vmatmul.msk.f32.gmra.mxu0 %vm285_vm0, %v980_v36 }
 0x219   : > { %v877_v37 = vpop.f32.mrf.mxu1 }
 0x21a   : > { %1783 = vst.msk [vmem:[%s2469_s30 + $0x1f8] sm:$0xff] %vm593_vm1, %v877_v37 }
 0x21c   : > { %1890 = vmatmul.msk.f32.gmra.mxu1 %vm285_vm0, %v2371_v22 }
 0x21f   : > { %v983_v13 = vpop.f32.mrf.mxu2 }
 0x220   : > { %1821 = vmatmul.msk.f32.gmra.mxu3 %vm285_vm0, %v983_v13  ;;  %1838 = vmatmul.msk.f32.gmra.mxu0 %vm285_vm0, %v983_v13 }
 0x221   : > { %v880_v38 = vpop.f32.mrf.mxu1 }
 0x222   : > { %1785 = vst.msk [vmem:[%s2469_s30 + $0x208] sm:$0xff] %vm593_vm1, %v880_v38 }
 0x224   : > { %1891 = vmatmul.msk.f32.gmra.mxu1 %vm285_vm0, %v2380_v23 }
 0x227   : > { %v986_v20 = vpop.f32.mrf.mxu2 }
 0x228   : > { %1822 = vmatmul.msk.f32.gmra.mxu3 %vm285_vm0, %v986_v20  ;;  %1839 = vmatmul.msk.f32.gmra.mxu0 %vm285_vm0, %v986_v20 }
 0x229   : > { %v883_v39 = vpop.f32.mrf.mxu1 }
 0x22a   : > { %1787 = vst.msk [vmem:[%s2469_s30 + $0x218] sm:$0xf] %vm626_vm2, %v883_v39 }
 0x22c   : > { %1892 = vmatmul.msk.f32.gmra.mxu1 %vm285_vm0, %v2389_v24 }
 0x22d   : > { %v1128_v22 = vpop.f32.mrf.mxu0 }
 0x22e   : > { %1842 = vst.msk [vmem:[%s2469_s30 + $0x228] sm:$0xff] %vm593_vm1, %v1128_v22 }
 0x22f   : > { %v989_v40 = vpop.f32.mrf.mxu2 }
 0x230   : > { %1823 = vmatmul.msk.f32.gmra.mxu3 %vm285_vm0, %v989_v40  ;;  %1840 = vmatmul.msk.f32.gmra.mxu0 %vm285_vm0, %v989_v40 }
 0x231   : > { %v1234_v23 = vpop.f32.mrf.mxu1 }
 0x232   : > { %1894 = vmatmul.msk.f32.vlgmr.msra.gmra.mxu2 %vm285_vm0, %v1234_v23 }
 0x233   : > { %v1060_v41 = vpop.f32.mrf.mxu3 }
 0x234   : > { %1841 = vst [vmem:[%s2469_s30 + $0x220] sm:$0xff] %v1060_v41  ;;  %1893 = vmatmul.msk.f32.gmra.mxu1 %vm285_vm0, %v2398_v26 }
 0x235   : > { %v1131_v24 = vpop.f32.mrf.mxu0 }
 0x236   : > { %1844 = vst.msk [vmem:[%s2469_s30 + $0x238] sm:$0xff] %vm593_vm1, %v1131_v24 }
 0x238   : > { %1911 = vmatmul.msk.f32.vlgmr.msra.gmra.mxu3 %vm285_vm0, %v1234_v23 }
 0x239   : > { %v1237_v42 = vpop.f32.mrf.mxu1 }
 0x23a   : > { %1895 = vmatmul.msk.f32.gmra.mxu2 %vm285_vm0, %v1237_v42 }
 0x23b   : > { %v1063_v43 = vpop.f32.mrf.mxu3 }
 0x23c   : > { %1843 = vst [vmem:[%s2469_s30 + $0x230] sm:$0xff] %v1063_v43 }
 0x23d   : > { %v1134_v44 = vpop.f32.mrf.mxu0 }
 0x23e   : > { %1846 = vst.msk [vmem:[%s2469_s30 + $0x248] sm:$0xff] %vm593_vm1, %v1134_v44 }
 0x240   : > { %1912 = vmatmul.msk.f32.gmra.mxu3 %vm285_vm0, %v1237_v42 }
 0x241   : > { %v1240_v45 = vpop.f32.mrf.mxu1 }
 0x242   : > { %1896 = vmatmul.msk.f32.gmra.mxu2 %vm285_vm0, %v1240_v45 }
 0x243   : > { %v1066_v26 = vpop.f32.mrf.mxu3 }
 0x244   : > { %1845 = vst [vmem:[%s2469_s30 + $0x240] sm:$0xff] %v1066_v26 }
 0x245   : > { %v1137_v46 = vpop.f32.mrf.mxu0 }
 0x246   : > { %1848 = vst.msk [vmem:[%s2469_s30 + $0x258] sm:$0xff] %vm593_vm1, %v1137_v46 }
 0x248   : > { %1913 = vmatmul.msk.f32.gmra.mxu3 %vm285_vm0, %v1240_v45 }
 0x249   : > { %v1243_v47 = vpop.f32.mrf.mxu1 }
 0x24a   : > { %1897 = vmatmul.msk.f32.gmra.mxu2 %vm285_vm0, %v1243_v47 }
 0x24b   : > { %v1069_v48 = vpop.f32.mrf.mxu3 }
 0x24c   : > { %1847 = vst [vmem:[%s2469_s30 + $0x250] sm:$0xff] %v1069_v48 }
 0x24d   : > { %v1140_v49 = vpop.f32.mrf.mxu0 }
 0x24e   : > { %1850 = vst.msk [vmem:[%s2469_s30 + $0x268] sm:$0xff] %vm593_vm1, %v1140_v49 }
 0x250   : > { %1914 = vmatmul.msk.f32.gmra.mxu3 %vm285_vm0, %v1243_v47 }
 0x251   : > { %v1246_v50 = vpop.f32.mrf.mxu1 }
 0x252   : > { %1898 = vmatmul.msk.f32.gmra.mxu2 %vm285_vm0, %v1246_v50 }
 0x253   : > { %v1072_v51 = vpop.f32.mrf.mxu3 }
 0x254   : > { %1849 = vst [vmem:[%s2469_s30 + $0x260] sm:$0xff] %v1072_v51 }
 0x255   : > { %v1143_v52 = vpop.f32.mrf.mxu0 }
 0x256   : > { %1852 = vst.msk [vmem:[%s2469_s30 + $0x278] sm:$0xff] %vm593_vm1, %v1143_v52 }
 0x258   : > { %1915 = vmatmul.msk.f32.gmra.mxu3 %vm285_vm0, %v1246_v50 }
 0x259   : > { %v1249_v53 = vpop.f32.mrf.mxu1 }
 0x25a   : > { %1899 = vmatmul.msk.f32.gmra.mxu2 %vm285_vm0, %v1249_v53 }
 0x25b   : > { %v1075_v54 = vpop.f32.mrf.mxu3 }
 0x25c   : > { %1851 = vst [vmem:[%s2469_s30 + $0x270] sm:$0xff] %v1075_v54 }
 0x25d   : > { %v1146_v55 = vpop.f32.mrf.mxu0 }
 0x25e   : > { %1854 = vst.msk [vmem:[%s2469_s30 + $0x288] sm:$0xff] %vm593_vm1, %v1146_v55 }
 0x260   : > { %1916 = vmatmul.msk.f32.gmra.mxu3 %vm285_vm0, %v1249_v53 }
 0x261   : > { %v1252_v56 = vpop.f32.mrf.mxu1 }
 0x262   : > { %1900 = vmatmul.msk.f32.gmra.mxu2 %vm285_vm0, %v1252_v56 }
 0x263   : > { %v1078_v57 = vpop.f32.mrf.mxu3 }
 0x264   : > { %1853 = vst [vmem:[%s2469_s30 + $0x280] sm:$0xff] %v1078_v57 }
 0x265   : > { %v1149_v58 = vpop.f32.mrf.mxu0 }
 0x266   : > { %1856 = vst.msk [vmem:[%s2469_s30 + $0x298] sm:$0xff] %vm593_vm1, %v1149_v58 }
 0x268   : > { %1917 = vmatmul.msk.f32.gmra.mxu3 %vm285_vm0, %v1252_v56 }
 0x269   : > { %v1255_v59 = vpop.f32.mrf.mxu1 }
 0x26a   : > { %1901 = vmatmul.msk.f32.gmra.mxu2 %vm285_vm0, %v1255_v59 }
 0x26b   : > { %v1081_v60 = vpop.f32.mrf.mxu3 }
 0x26c   : > { %1855 = vst [vmem:[%s2469_s30 + $0x290] sm:$0xff] %v1081_v60 }
 0x26d   : > { %v1152_v61 = vpop.f32.mrf.mxu0 }
 0x26e   : > { %1858 = vst.msk [vmem:[%s2469_s30 + $0x2a8] sm:$0xff] %vm593_vm1, %v1152_v61 }
 0x270   : > { %1918 = vmatmul.msk.f32.gmra.mxu3 %vm285_vm0, %v1255_v59 }
 0x271   : > { %v1258_v62 = vpop.f32.mrf.mxu1 }
 0x272   : > { %1902 = vmatmul.msk.f32.gmra.mxu2 %vm285_vm0, %v1258_v62 }
 0x273   : > { %v1084_v63 = vpop.f32.mrf.mxu3 }
 0x274   : > { %1857 = vst [vmem:[%s2469_s30 + $0x2a0] sm:$0xff] %v1084_v63 }
 0x275   : > { %v1155_v2 = vpop.f32.mrf.mxu0 }
 0x276   : > { %1860 = vst.msk [vmem:[%s2469_s30 + $0x2b8] sm:$0xff] %vm593_vm1, %v1155_v2 }
 0x278   : > { %1919 = vmatmul.msk.f32.gmra.mxu3 %vm285_vm0, %v1258_v62 }
 0x279   : > { %v1261_v0 = vpop.f32.mrf.mxu1 }
 0x27a   : > { %1903 = vmatmul.msk.f32.gmra.mxu2 %vm285_vm0, %v1261_v0 }
 0x27b   : > { %v1087_v1 = vpop.f32.mrf.mxu3 }
 0x27c   : > { %1859 = vst [vmem:[%s2469_s30 + $0x2b0] sm:$0xff] %v1087_v1 }
 0x27d   : > { %v1158_v3 = vpop.f32.mrf.mxu0 }
 0x27e   : > { %1862 = vst.msk [vmem:[%s2469_s30 + $0x2c8] sm:$0xff] %vm593_vm1, %v1158_v3 }
 0x280   : > { %1920 = vmatmul.msk.f32.gmra.mxu3 %vm285_vm0, %v1261_v0 }
 0x281   : > { %v1264_v14 = vpop.f32.mrf.mxu1 }
 0x282   : > { %1904 = vmatmul.msk.f32.gmra.mxu2 %vm285_vm0, %v1264_v14 }
 0x283   : > { %v1090_v15 = vpop.f32.mrf.mxu3 }
 0x284   : > { %1861 = vst [vmem:[%s2469_s30 + $0x2c0] sm:$0xff] %v1090_v15 }
 0x285   : > { %v1161_v4 = vpop.f32.mrf.mxu0 }
 0x286   : > { %1864 = vst.msk [vmem:[%s2469_s30 + $0x2d8] sm:$0xff] %vm593_vm1, %v1161_v4 }
 0x288   : > { %1921 = vmatmul.msk.f32.gmra.mxu3 %vm285_vm0, %v1264_v14 }
 0x289   : > { %v1267_v16 = vpop.f32.mrf.mxu1 }
 0x28a   : > { %1905 = vmatmul.msk.f32.gmra.mxu2 %vm285_vm0, %v1267_v16 }
 0x28b   : > { %v1093_v17 = vpop.f32.mrf.mxu3 }
 0x28c   : > { %1863 = vst [vmem:[%s2469_s30 + $0x2d0] sm:$0xff] %v1093_v17 }
 0x28d   : > { %v1164_v5 = vpop.f32.mrf.mxu0 }
 0x28e   : > { %1866 = vst.msk [vmem:[%s2469_s30 + $0x2e8] sm:$0xff] %vm593_vm1, %v1164_v5 }
 0x290   : > { %1922 = vmatmul.msk.f32.gmra.mxu3 %vm285_vm0, %v1267_v16 }
 0x291   : > { %v1270_v18 = vpop.f32.mrf.mxu1 }
 0x292   : > { %1906 = vmatmul.msk.f32.gmra.mxu2 %vm285_vm0, %v1270_v18 }
 0x293   : > { %v1096_v19 = vpop.f32.mrf.mxu3 }
 0x294   : > { %1865 = vst [vmem:[%s2469_s30 + $0x2e0] sm:$0xff] %v1096_v19 }
 0x295   : > { %v1167_v6 = vpop.f32.mrf.mxu0 }
 0x296   : > { %1868 = vst.msk [vmem:[%s2469_s30 + $0x2f8] sm:$0xff] %vm593_vm1, %v1167_v6 }
 0x298   : > { %1923 = vmatmul.msk.f32.gmra.mxu3 %vm285_vm0, %v1270_v18 }
 0x299   : > { %v1273_v21 = vpop.f32.mrf.mxu1 }
 0x29a   : > { %1907 = vmatmul.msk.f32.gmra.mxu2 %vm285_vm0, %v1273_v21 }
 0x29b   : > { %v1099_v25 = vpop.f32.mrf.mxu3 }
 0x29c   : > { %1867 = vst [vmem:[%s2469_s30 + $0x2f0] sm:$0xff] %v1099_v25 }
 0x29d   : > { %v1170_v7 = vpop.f32.mrf.mxu0 }
 0x29e   : > { %1870 = vst.msk [vmem:[%s2469_s30 + $0x308] sm:$0xff] %vm593_vm1, %v1170_v7 }
 0x2a0   : > { %1924 = vmatmul.msk.f32.gmra.mxu3 %vm285_vm0, %v1273_v21 }
 0x2a1   : > { %v1276_v27 = vpop.f32.mrf.mxu1 }
 0x2a2   : > { %1908 = vmatmul.msk.f32.gmra.mxu2 %vm285_vm0, %v1276_v27 }
 0x2a3   : > { %v1102_v28 = vpop.f32.mrf.mxu3 }
 0x2a4   : > { %1869 = vst [vmem:[%s2469_s30 + $0x300] sm:$0xff] %v1102_v28 }
 0x2a5   : > { %v1173_v8 = vpop.f32.mrf.mxu0 }
 0x2a6   : > { %1872 = vst.msk [vmem:[%s2469_s30 + $0x318] sm:$0xff] %vm593_vm1, %v1173_v8 }
 0x2a8   : > { %1925 = vmatmul.msk.f32.gmra.mxu3 %vm285_vm0, %v1276_v27 }
 0x2a9   : > { %v1279_v29 = vpop.f32.mrf.mxu1 }
 0x2aa   : > { %1909 = vmatmul.msk.f32.gmra.mxu2 %vm285_vm0, %v1279_v29 }
 0x2ab   : > { %v1105_v30 = vpop.f32.mrf.mxu3 }
 0x2ac   : > { %1871 = vst [vmem:[%s2469_s30 + $0x310] sm:$0xff] %v1105_v30 }
 0x2ad   : > { %v1176_v9 = vpop.f32.mrf.mxu0 }
 0x2ae   : > { %1874 = vst.msk [vmem:[%s2469_s30 + $0x328] sm:$0xf] %vm626_vm2, %v1176_v9 }
 0x2b0   : > { %1926 = vmatmul.msk.f32.gmra.mxu3 %vm285_vm0, %v1279_v29 }
 0x2b1   : > { %v1282_v31 = vpop.f32.mrf.mxu1 }
 0x2b2   : > { %1910 = vmatmul.msk.f32.gmra.mxu2 %vm285_vm0, %v1282_v31 }
 0x2b3   : > { %v1108_v32 = vpop.f32.mrf.mxu3 }
 0x2b4   : > { %1873 = vst [vmem:[%s2469_s30 + $0x320] sm:$0xf] %v1108_v32 }
 0x2b5   : > { %v1353_v10 = vpop.f32.mrf.mxu2 }
 0x2b6   : > { %1928 = vst [vmem:[%s2469_s30 + $0x330] sm:$0xff] %v1353_v10 }
 0x2b8   : > { %1927 = vmatmul.msk.f32.gmra.mxu3 %vm285_vm0, %v1282_v31 }
 0x2bb   : > { %v1421_v33 = vpop.f32.mrf.mxu3 }
 0x2bc   : > { %1929 = vst.msk [vmem:[%s2469_s30 + $0x338] sm:$0xff] %vm593_vm1, %v1421_v33 }
 0x2bd   : > { %v1356_v34 = vpop.f32.mrf.mxu2 }
 0x2be   : > { %1930 = vst [vmem:[%s2469_s30 + $0x340] sm:$0xff] %v1356_v34 }
 0x2c3   : > { %v1424_v11 = vpop.f32.mrf.mxu3 }
 0x2c4   : > { %1931 = vst.msk [vmem:[%s2469_s30 + $0x348] sm:$0xff] %vm593_vm1, %v1424_v11 }
 0x2c5   : > { %v1359_v35 = vpop.f32.mrf.mxu2 }
 0x2c6   : > { %1932 = vst [vmem:[%s2469_s30 + $0x350] sm:$0xff] %v1359_v35 }
 0x2cb   : > { %v1427_v12 = vpop.f32.mrf.mxu3 }
 0x2cc   : > { %1933 = vst.msk [vmem:[%s2469_s30 + $0x358] sm:$0xff] %vm593_vm1, %v1427_v12 }
 0x2cd   : > { %v1362_v36 = vpop.f32.mrf.mxu2 }
 0x2ce   : > { %1934 = vst [vmem:[%s2469_s30 + $0x360] sm:$0xff] %v1362_v36 }
 0x2d3   : > { %v1430_v37 = vpop.f32.mrf.mxu3 }
 0x2d4   : > { %1935 = vst.msk [vmem:[%s2469_s30 + $0x368] sm:$0xff] %vm593_vm1, %v1430_v37 }
 0x2d5   : > { %v1365_v13 = vpop.f32.mrf.mxu2 }
 0x2d6   : > { %1936 = vst [vmem:[%s2469_s30 + $0x370] sm:$0xff] %v1365_v13 }
 0x2db   : > { %v1433_v38 = vpop.f32.mrf.mxu3 }
 0x2dc   : > { %1937 = vst.msk [vmem:[%s2469_s30 + $0x378] sm:$0xff] %vm593_vm1, %v1433_v38 }
 0x2dd   : > { %v1368_v20 = vpop.f32.mrf.mxu2 }
 0x2de   : > { %1938 = vst [vmem:[%s2469_s30 + $0x380] sm:$0xff] %v1368_v20 }
 0x2e3   : > { %v1436_v39 = vpop.f32.mrf.mxu3 }
 0x2e4   : > { %1939 = vst.msk [vmem:[%s2469_s30 + $0x388] sm:$0xff] %vm593_vm1, %v1436_v39 }
 0x2e5   : > { %v1371_v22 = vpop.f32.mrf.mxu2 }
 0x2e6   : > { %1940 = vst [vmem:[%s2469_s30 + $0x390] sm:$0xff] %v1371_v22 }
 0x2eb   : > { %v1439_v40 = vpop.f32.mrf.mxu3 }
 0x2ec   : > { %1941 = vst.msk [vmem:[%s2469_s30 + $0x398] sm:$0xff] %vm593_vm1, %v1439_v40 }
 0x2ed   : > { %v1374_v23 = vpop.f32.mrf.mxu2 }
 0x2ee   : > { %1942 = vst [vmem:[%s2469_s30 + $0x3a0] sm:$0xff] %v1374_v23 }
 0x2f3   : > { %v1442_v41 = vpop.f32.mrf.mxu3 }
 0x2f4   : > { %1943 = vst.msk [vmem:[%s2469_s30 + $0x3a8] sm:$0xff] %vm593_vm1, %v1442_v41 }
 0x2f5   : > { %v1377_v24 = vpop.f32.mrf.mxu2 }
 0x2f6   : > { %1944 = vst [vmem:[%s2469_s30 + $0x3b0] sm:$0xff] %v1377_v24 }
 0x2fb   : > { %v1445_v42 = vpop.f32.mrf.mxu3 }
 0x2fc   : > { %1945 = vst.msk [vmem:[%s2469_s30 + $0x3b8] sm:$0xff] %vm593_vm1, %v1445_v42 }
 0x2fd   : > { %v1380_v43 = vpop.f32.mrf.mxu2 }
 0x2fe   : > { %1946 = vst [vmem:[%s2469_s30 + $0x3c0] sm:$0xff] %v1380_v43 }
 0x303   : > { %v1448_v44 = vpop.f32.mrf.mxu3 }
 0x304   : > { %1947 = vst.msk [vmem:[%s2469_s30 + $0x3c8] sm:$0xff] %vm593_vm1, %v1448_v44 }
 0x305   : > { %v1383_v45 = vpop.f32.mrf.mxu2 }
 0x306   : > { %1948 = vst [vmem:[%s2469_s30 + $0x3d0] sm:$0xff] %v1383_v45 }
 0x30b   : > { %v1451_v26 = vpop.f32.mrf.mxu3 }
 0x30c   : > { %1949 = vst.msk [vmem:[%s2469_s30 + $0x3d8] sm:$0xff] %vm593_vm1, %v1451_v26 }
 0x30d   : > { %v1386_v46 = vpop.f32.mrf.mxu2 }
 0x30e   : > { %1950 = vst [vmem:[%s2469_s30 + $0x3e0] sm:$0xff] %v1386_v46 }
 0x313   : > { %v1454_v47 = vpop.f32.mrf.mxu3 }
 0x314   : > { %1951 = vst.msk [vmem:[%s2469_s30 + $0x3e8] sm:$0xff] %vm593_vm1, %v1454_v47 }
 0x315   : > { %v1389_v48 = vpop.f32.mrf.mxu2 }
 0x316   : > { %1952 = vst [vmem:[%s2469_s30 + $0x3f0] sm:$0xff] %v1389_v48 }
 0x31b   : > { %v1457_v49 = vpop.f32.mrf.mxu3 }
 0x31c   : > { %1953 = vst.msk [vmem:[%s2469_s30 + $0x3f8] sm:$0xff] %vm593_vm1, %v1457_v49 }
 0x31d   : > { %v1392_v50 = vpop.f32.mrf.mxu2 }
 0x31e   : > { %1954 = vst [vmem:[%s2469_s30 + $0x400] sm:$0xff] %v1392_v50 }
 0x323   : > { %v1460_v51 = vpop.f32.mrf.mxu3 }
 0x324   : > { %1955 = vst.msk [vmem:[%s2469_s30 + $0x408] sm:$0xff] %vm593_vm1, %v1460_v51 }
 0x325   : > { %v1395_v52 = vpop.f32.mrf.mxu2 }
 0x326   : > { %1956 = vst [vmem:[%s2469_s30 + $0x410] sm:$0xff] %v1395_v52 }
 0x32b   : > { %v1463_v53 = vpop.f32.mrf.mxu3 }
 0x32c   : > { %1957 = vst.msk [vmem:[%s2469_s30 + $0x418] sm:$0xff] %vm593_vm1, %v1463_v53 }
 0x32d   : > { %v1398_v54 = vpop.f32.mrf.mxu2 }
 0x32e   : > { %1958 = vst [vmem:[%s2469_s30 + $0x420] sm:$0xff] %v1398_v54 }
 0x333   : > { %v1466_v55 = vpop.f32.mrf.mxu3 }
 0x334   : > { %1959 = vst.msk [vmem:[%s2469_s30 + $0x428] sm:$0xff] %vm593_vm1, %v1466_v55 }
 0x335   : > { %v1401_v56 = vpop.f32.mrf.mxu2 }
 0x336   : > { %1960 = vst [vmem:[%s2469_s30 + $0x430] sm:$0xf] %v1401_v56 }
 0x33b   : > { %v1469_v57 = vpop.f32.mrf.mxu3 }
 0x33c   : > { %1961 = vst.msk [vmem:[%s2469_s30 + $0x438] sm:$0xf] %vm626_vm2, %v1469_v57 }
 0x33d PF: > { %s17_s17 = sadd.s32 1, %s2151_s17   ;;  %s2871_s12 = smov %s2135_s13 }
 0x33e   : > { %p14_p2 = scmp.ge.s32.totalorder %s17_s17, 4   ;;  %s2872_s13 = smov %s2139_s14 }
 0x33f   : > { %s2873_s14 = smov %s2248_s9  ;;  %s2874_s15 = smov %s2147_s16 }
 0x340   : > { %s2875_s16 = smov %s2877_s29  ;;  %16 = sbr.rel (!%p14_p2) target bundleno = 5 (0x5), region = 86 }
 0x345   :  { %1542 = vsyncpa [#allocation3], 1 }
 0x346   :  { %1544 = vsyncpa [#allocation3 + $0x1], 1 }
 0x347   :  { %1545 = vsyncpa [#allocation5], 1 }
 0x348   :  { %1547 = vsyncpa [#allocation5 + $0x1], 1 }

</bundles_post_ra>
